<compile_context>
chip_gen: v7x
topology: tpu7x:2x2x1
jax: 0.10.0
libtpu: 0.0.40
codegen_flags: <defaults>
</compile_context>

<pallas_src>
import jax
import jax.numpy as jnp
from jax import lax
from jax.experimental import pallas as pl
from jax.experimental.pallas import tpu as pltpu


def _round_up(n, m):
    return ((n + m - 1) // m) * m


def _cdiv(a, b):
    return -(-a // b)


def _adapter_kernel(alpha_ref,   # SMEM (1,)          residual mixing ratio
                    x_ref,       # VMEM (TB, Din)     image embedding tile
                    w1_ref,      # VMEM (Din, Hp)
                    b1_ref,      # VMEM (1, Hp)       f32
                    w2_ref,      # VMEM (Hp, Din)
                    b2_ref,      # VMEM (1, Din)      f32
                    tT_ref,      # VMEM (Din, TN)     normalized*exp(scale) text, transposed
                    o_ref,       # VMEM (TB, TN)      logits tile (f32)
                    y_ref):      # VMEM scratch (TB, Din) cached normalized embeddings
    # Adapter MLP + residual mix + L2 normalize: only on the first class tile
    # of each batch tile; reused from scratch for the remaining class tiles.
    @pl.when(pl.program_id(1) == 0)
    def _():
        alpha = alpha_ref[0]
        xv = x_ref[...]                      # compute dtype (bf16/f32)
        xf = xv.astype(jnp.float32)          # f32 copy for the residual term
        h = jnp.dot(xv, w1_ref[...], preferred_element_type=jnp.float32)
        h = jnp.maximum(h + b1_ref[...], 0.0)
        y = jnp.dot(h.astype(w2_ref.dtype), w2_ref[...],
                    preferred_element_type=jnp.float32)
        y = y + b2_ref[...]
        y = alpha * y + (1.0 - alpha) * xf
        inv_norm = lax.rsqrt(jnp.sum(y * y, axis=1, keepdims=True) + 1e-12)
        y_ref[...] = (y * inv_norm).astype(y_ref.dtype)

    # logits tile = y_norm @ (exp(logit_scale) * text_norm).T   (lane-dense store)
    o_ref[...] = jnp.dot(y_ref[...], tT_ref[...],
                         preferred_element_type=jnp.float32)


def custom_adapter_forward(x, w1, b1, w2, b2, text_embeddings, logit_scale, alpha,
                           *, compute_dtype=jnp.bfloat16, block_b=512,
                           block_c=2048, vmem_budget_bytes=None):
    """Pallas implementation of CustomAdapter.forward.

    x:                (B, Din) image embeddings (batch[0])
    w1, b1:           (Din, H), (H,) or (1, H)      adapter layer 1
    w2, b2:           (H, Din), (Din,) or (1, Din)  adapter layer 2
    text_embeddings:  (C, Din)
    logit_scale:      scalar / (1,) parameter (pre-exp)
    alpha:            residual mixing ratio (runtime scalar, no recompile)
    returns:          (B, C) float32 logits
    """
    cd = jnp.dtype(compute_dtype)
    itemsize = cd.itemsize
    pack = {4: 8, 2: 16, 1: 32}.get(itemsize, 8)     # sublane packing of cd

    B, Din = x.shape
    H = w1.shape[1]
    C = text_embeddings.shape[0]
    H_pad = _round_up(H, 128)

    # ---- generation-aware VMEM budget -------------------------------------
    try:
        vmem_cap = int(pltpu.get_tpu_info().vmem_capacity_bytes)
    except Exception:
        vmem_cap = 64 * 1024 * 1024          # conservative (v7x per-TC)
    if vmem_budget_bytes is None:
        vmem_budget_bytes = (vmem_cap * 3) // 4
    budget = min(int(vmem_budget_bytes), vmem_cap - (8 << 20))
    vmem_limit = budget + (8 << 20)

    # ---- class tiling: keep text resident when small, tile when large -----
    C_pad128 = _round_up(C, 128)
    tn_budget_cap = max(128, (((budget // 3) // max(1, 2 * Din * itemsize))
                              // 128) * 128)
    TN = min(C_pad128, _round_up(int(block_c), 128), tn_budget_cap)
    C_pad = _round_up(C, TN)
    n_j = C_pad // TN

    # ---- VMEM accounting (conservative: residents counted double-buffered) -
    resident_bytes = itemsize * (2 * Din * H_pad) + 4 * (H_pad + Din)
    text_tile_bytes = itemsize * Din * TN
    if n_j == 1:
        fixed = 2 * (resident_bytes + text_tile_bytes)
    else:
        fixed = 2 * resident_bytes + 2 * text_tile_bytes
    per_row = 3 * Din * itemsize + 2 * TN * 4   # x (2 bufs) + y scratch + out (2 bufs f32)
    avail = budget - fixed
    if avail < pack * per_row:
        raise ValueError(
            f"CustomAdapter kernel cannot fit VMEM budget ({budget} B): "
            f"resident={fixed} B, per-row={per_row} B. Lower block_c or raise "
            f"vmem_budget_bytes.")

    # ---- batch tile: large, sublane-packed, bounded last-tile waste, >=2 steps
    TB = min(int(block_b), 1024, avail // per_row, _round_up(B, pack))
    TB = max(pack, (TB // pack) * pack)
    if B >= 2 * pack:                            # give megacore >=2 batch tiles
        TB = min(TB, _round_up(_cdiv(B, 2), pack))
    n_i = _cdiv(B, TB)
    TB = _round_up(_cdiv(B, n_i), pack)
    B_pad = n_i * TB

    # ---- one-time operand prep (hoisted out of the per-block kernel work) --
    t = text_embeddings.astype(jnp.float32)
    t = t * lax.rsqrt(jnp.sum(t * t, axis=1, keepdims=True) + 1e-12)
    scale = jnp.exp(jnp.asarray(logit_scale, jnp.float32).reshape(-1)[0])
    t = (t * scale).astype(cd)                   # fold exp(logit_scale) into text
    t_T = jnp.zeros((Din, C_pad), cd).at[:, :C].set(t.T)

    w1_p = jnp.zeros((Din, H_pad), cd).at[:, :H].set(w1.astype(cd))
    b1_p = jnp.zeros((1, H_pad), jnp.float32).at[:, :H].set(
        jnp.asarray(b1, jnp.float32).reshape(1, -1))
    w2_p = jnp.zeros((H_pad, Din), cd).at[:H, :].set(w2.astype(cd))
    b2_p = jnp.asarray(b2, jnp.float32).reshape(1, -1)

    x_p = x.astype(cd)
    if B_pad != B:
        x_p = jnp.pad(x_p, ((0, B_pad - B), (0, 0)))

    alpha_arr = jnp.asarray(alpha, jnp.float32).reshape(1)

    cost = pl.CostEstimate(
        flops=int(4 * B_pad * Din * H_pad + 2 * B_pad * Din * C_pad),
        transcendentals=int(B_pad),
        bytes_accessed=int(x_p.nbytes + w1_p.nbytes + b1_p.nbytes + w2_p.nbytes
                           + b2_p.nbytes
                           + t_T.nbytes * (n_i if n_j > 1 else 1)
                           + B_pad * C_pad * 4),
    )

    def build(single_buffer_residents):
        res_kwargs = ({"pipeline_mode": pl.Buffered(1)}
                      if single_buffer_residents else {})
        text_kwargs = res_kwargs if n_j == 1 else {}
        grid_spec = pltpu.PrefetchScalarGridSpec(
            num_scalar_prefetch=1,                       # alpha -> SMEM
            grid=(n_i, n_j),
            in_specs=[
                pl.BlockSpec((TB, Din), lambda i, j, a: (i, 0)),               # x (pipelined)
                pl.BlockSpec((Din, H_pad), lambda i, j, a: (0, 0), **res_kwargs),
                pl.BlockSpec((1, H_pad), lambda i, j, a: (0, 0), **res_kwargs),
                pl.BlockSpec((H_pad, Din), lambda i, j, a: (0, 0), **res_kwargs),
                pl.BlockSpec((1, Din), lambda i, j, a: (0, 0), **res_kwargs),
                pl.BlockSpec((Din, TN), lambda i, j, a: (0, j), **text_kwargs),  # text^T
            ],
            out_specs=pl.BlockSpec((TB, TN), lambda i, j, a: (i, j)),
            scratch_shapes=[pltpu.VMEM((TB, Din), cd)],   # cached normalized embeddings
        )
        return pl.pallas_call(
            _adapter_kernel,
            out_shape=jax.ShapeDtypeStruct((B_pad, C_pad), jnp.float32),
            grid_spec=grid_spec,
            compiler_params=pltpu.CompilerParams(
                dimension_semantics=("parallel", "arbitrary"),
                vmem_limit_bytes=vmem_limit),
            cost_estimate=cost,
        )

    args = (alpha_arr, x_p, w1_p, b1_p, w2_p, b2_p, t_T)
    try:
        # Preferred path: residents single-buffered (halves resident VMEM).
        out = build(True)(*args)
    except Exception:
        # Robust fallback if this Pallas version rejects pipeline_mode here;
        # VMEM accounting above already assumes double-buffered residents.
        out = build(False)(*args)

    return out[:B, :C]


def reference_forward(x, w1, b1, w2, b2, text, logit_scale, alpha):
    h = jnp.maximum(x @ w1 + jnp.asarray(b1).reshape(1, -1), 0.0)
    y = h @ w2 + jnp.asarray(b2).reshape(1, -1)
    y = alpha * y + (1.0 - alpha) * x
    y = y / jnp.linalg.norm(y, axis=1, keepdims=True)
    t = text / jnp.linalg.norm(text, axis=1, keepdims=True)
    return (y @ t.T) * jnp.exp(jnp.asarray(logit_scale).reshape(-1)[0])


if __name__ == "__main__":
    # Small deterministic setup; block_b/block_c chosen so BOTH grid axes have
    # >1 step (batch pipeline + class-tile scratch reuse are exercised).
    B, Din, H, C = 48, 32, 24, 200
    alpha = 0.6
    initial_logit_scale = 2.659260036932778   # ln(1/0.07), CLIP default

    key = jax.random.PRNGKey(0)
    kx, kt, k1, k2, kb1, kb2 = jax.random.split(key, 6)

    x = jax.random.normal(kx, (B, Din), dtype=jnp.float32)        # batch[0]
    text = jax.random.normal(kt, (C, Din), dtype=jnp.float32)     # text_embeddings

    w1 = jax.random.normal(k1, (Din, H), dtype=jnp.float32) * (1.0 / jnp.sqrt(Din))
    b1 = jax.random.normal(kb1, (1, H), dtype=jnp.float32) * 0.01
    w2 = jax.random.normal(k2, (H, Din), dtype=jnp.float32) * (1.0 / jnp.sqrt(H))
    b2 = jax.random.normal(kb2, (1, Din), dtype=jnp.float32) * 0.01

    logit_scale = jnp.array([initial_logit_scale], dtype=jnp.float32)

    ref = reference_forward(x, w1, b1, w2, b2, text, logit_scale, alpha)

    # 1) f32 compute path: tight numerical check against the reference.
    logits_f32 = custom_adapter_forward(x, w1, b1, w2, b2, text, logit_scale, alpha,
                                        compute_dtype=jnp.float32,
                                        block_b=16, block_c=128)
    logits_f32 = jax.block_until_ready(logits_f32)
    assert logits_f32.shape == (B, C)
    assert jnp.allclose(logits_f32, ref, atol=1e-4, rtol=1e-4), "f32 mismatch vs reference"

    # 2) default bf16-operand path (perf config): loose check (bf16 rounding of
    #    matmul operands; accumulation/elementwise are still f32).
    logits_bf16 = custom_adapter_forward(x, w1, b1, w2, b2, text, logit_scale, alpha,
                                         block_b=16, block_c=128)
    logits_bf16 = jax.block_until_ready(logits_bf16)
    assert logits_bf16.shape == (B, C)
    assert jnp.allclose(logits_bf16, ref, atol=0.3, rtol=0.05), "bf16 mismatch vs reference"

    print("KERNEL_OK")
</pallas_src>

<mosaic_0001>
module attributes {stable_mosaic.version = 11 : i64} {
  func.func @_adapter_kernel(%arg0: i32, %arg1: i32, %arg2: memref<1xf32, #tpu.memory_space<smem>>, %arg3: memref<16x32xf32, #tpu.memory_space<vmem>>, %arg4: memref<32x128xf32, #tpu.memory_space<vmem>>, %arg5: memref<1x128xf32, #tpu.memory_space<vmem>>, %arg6: memref<128x32xf32, #tpu.memory_space<vmem>>, %arg7: memref<1x32xf32, #tpu.memory_space<vmem>>, %arg8: memref<32x128xf32, #tpu.memory_space<vmem>>, %arg9: memref<16x128xf32, #tpu.memory_space<vmem>>, %arg10: memref<16x32xf32, #tpu.memory_space<vmem>>) attributes {dimension_semantics = [#tpu.dimension_semantics<parallel>, #tpu.dimension_semantics<arbitrary>], iteration_bounds = array<i64: 3, 2>, scalar_prefetch = 1 : i64, scratch_operands = 1 : i64, tpu.core_type = #tpu.core_type<tc>, window_params = [{transform_indices = @transform_0, window_bounds = array<i64: 16, 32>}, {pipeline_mode = #tpu.pipeline_mode<synchronous>, transform_indices = @transform_1, window_bounds = array<i64: 32, 128>}, {pipeline_mode = #tpu.pipeline_mode<synchronous>, transform_indices = @transform_2, window_bounds = array<i64: 1, 128>}, {pipeline_mode = #tpu.pipeline_mode<synchronous>, transform_indices = @transform_3, window_bounds = array<i64: 128, 32>}, {pipeline_mode = #tpu.pipeline_mode<synchronous>, transform_indices = @transform_4, window_bounds = array<i64: 1, 32>}, {transform_indices = @transform_5, window_bounds = array<i64: 32, 128>}, {transform_indices = @transform_6, window_bounds = array<i64: 16, 128>}]} {
    %c0_i32 = arith.constant 0 : i32
    %0 = arith.cmpi eq, %arg1, %c0_i32 : i32
    %1 = arith.extui %0 : i1 to i32
    %c0_i32_0 = arith.constant 0 : i32
    %2 = arith.cmpi ne, %1, %c0_i32_0 : i32
    scf.if %2 {
      %c0_6 = arith.constant 0 : index
      %7 = memref.load %arg2[%c0_6] : memref<1xf32, #tpu.memory_space<smem>>
      %c0_7 = arith.constant 0 : index
      %c0_8 = arith.constant 0 : index
      %8 = vector.load %arg3[%c0_7, %c0_8] : memref<16x32xf32, #tpu.memory_space<vmem>>, vector<16x32xf32>
      %c0_9 = arith.constant 0 : index
      %c0_10 = arith.constant 0 : index
      %9 = vector.load %arg4[%c0_9, %c0_10] : memref<32x128xf32, #tpu.memory_space<vmem>>, vector<32x128xf32>
      %cst_11 = arith.constant dense<0.000000e+00> : vector<16x128xf32>
      %10 = tpu.matmul %8, %9, %cst_11 {dimension_numbers = #tpu.dot_dimension_numbers<[1], [0], [0], [1], [0, 0, 1, 1], [], []>} : vector<16x32xf32>, vector<32x128xf32>, vector<16x128xf32> -> vector<16x128xf32>
      %c0_12 = arith.constant 0 : index
      %c0_13 = arith.constant 0 : index
      %11 = vector.load %arg5[%c0_12, %c0_13] : memref<1x128xf32, #tpu.memory_space<vmem>>, vector<1x128xf32>
      %12 = vector.broadcast %11 : vector<1x128xf32> to vector<16x128xf32>
      %13 = arith.addf %10, %12 : vector<16x128xf32>
      %cst_14 = arith.constant 0.000000e+00 : f32
      %14 = vector.broadcast %cst_14 : f32 to vector<16x128xf32>
      %15 = arith.maximumf %13, %14 : vector<16x128xf32>
      %c0_15 = arith.constant 0 : index
      %c0_16 = arith.constant 0 : index
      %16 = vector.load %arg6[%c0_15, %c0_16] : memref<128x32xf32, #tpu.memory_space<vmem>>, vector<128x32xf32>
      %cst_17 = arith.constant dense<0.000000e+00> : vector<16x32xf32>
      %17 = tpu.matmul %15, %16, %cst_17 {dimension_numbers = #tpu.dot_dimension_numbers<[1], [0], [0], [1], [0, 0, 1, 1], [], []>} : vector<16x128xf32>, vector<128x32xf32>, vector<16x32xf32> -> vector<16x32xf32>
      %c0_18 = arith.constant 0 : index
      %c0_19 = arith.constant 0 : index
      %18 = vector.load %arg7[%c0_18, %c0_19] : memref<1x32xf32, #tpu.memory_space<vmem>>, vector<1x32xf32>
      %19 = vector.broadcast %18 : vector<1x32xf32> to vector<16x32xf32>
      %20 = arith.addf %17, %19 : vector<16x32xf32>
      %21 = vector.broadcast %7 : f32 to vector<16x32xf32>
      %22 = arith.mulf %21, %20 : vector<16x32xf32>
      %cst_20 = arith.constant 1.000000e+00 : f32
      %23 = arith.subf %cst_20, %7 : f32
      %24 = vector.broadcast %23 : f32 to vector<16x32xf32>
      %25 = arith.mulf %24, %8 : vector<16x32xf32>
      %26 = arith.addf %22, %25 : vector<16x32xf32>
      %27 = arith.mulf %26, %26 : vector<16x32xf32>
      %cst_21 = arith.constant dense<0.000000e+00> : vector<16xf32>
      %28 = vector.multi_reduction <add>, %27, %cst_21 [1] : vector<16x32xf32> to vector<16xf32>
      %29 = vector.shape_cast %28 : vector<16xf32> to vector<16x1xf32>
      %cst_22 = arith.constant 9.99999996E-13 : f32
      %30 = vector.broadcast %cst_22 : f32 to vector<16x1xf32>
      %31 = arith.addf %29, %30 : vector<16x1xf32>
      %32 = math.rsqrt %31 : vector<16x1xf32>
      %33 = vector.broadcast %32 : vector<16x1xf32> to vector<16x32xf32>
      %34 = arith.mulf %26, %33 : vector<16x32xf32>
      %c0_23 = arith.constant 0 : index
      %c0_24 = arith.constant 0 : index
      %35 = vector.load %arg10[%c0_23, %c0_24] : memref<16x32xf32, #tpu.memory_space<vmem>>, vector<16x32xf32>
      tpu.vector_store %arg10[%c0_23, %c0_24], %34 {strides = array<i32>} : memref<16x32xf32, #tpu.memory_space<vmem>>, vector<16x32xf32>,
    } else {
    }
    %c0 = arith.constant 0 : index
    %c0_1 = arith.constant 0 : index
    %3 = vector.load %arg10[%c0, %c0_1] : memref<16x32xf32, #tpu.memory_space<vmem>>, vector<16x32xf32>
    %c0_2 = arith.constant 0 : index
    %c0_3 = arith.constant 0 : index
    %4 = vector.load %arg8[%c0_2, %c0_3] : memref<32x128xf32, #tpu.memory_space<vmem>>, vector<32x128xf32>
    %cst = arith.constant dense<0.000000e+00> : vector<16x128xf32>
    %5 = tpu.matmul %3, %4, %cst {dimension_numbers = #tpu.dot_dimension_numbers<[1], [0], [0], [1], [0, 0, 1, 1], [], []>} : vector<16x32xf32>, vector<32x128xf32>, vector<16x128xf32> -> vector<16x128xf32>
    %c0_4 = arith.constant 0 : index
    %c0_5 = arith.constant 0 : index
    %6 = vector.load %arg9[%c0_4, %c0_5] : memref<16x128xf32, #tpu.memory_space<vmem>>, vector<16x128xf32>
    tpu.vector_store %arg9[%c0_4, %c0_5], %5 {strides = array<i32>} : memref<16x128xf32, #tpu.memory_space<vmem>>, vector<16x128xf32>,
    return
  }
  func.func @transform_0(%arg0: i32, %arg1: i32, %arg2: memref<1xf32, #tpu.memory_space<smem>>) -> (i32, i32) {
    %c0_i32 = arith.constant 0 : i32
    %c0_i32_0 = arith.constant 0 : i32
    return %arg0, %c0_i32 : i32, i32
  }
  func.func @transform_1(%arg0: i32, %arg1: i32, %arg2: memref<1xf32, #tpu.memory_space<smem>>) -> (i32, i32) {
    %c0_i32 = arith.constant 0 : i32
    %c0_i32_0 = arith.constant 0 : i32
    %c0_i32_1 = arith.constant 0 : i32
    return %c0_i32, %c0_i32_0 : i32, i32
  }
  func.func @transform_2(%arg0: i32, %arg1: i32, %arg2: memref<1xf32, #tpu.memory_space<smem>>) -> (i32, i32) {
    %c0_i32 = arith.constant 0 : i32
    %c0_i32_0 = arith.constant 0 : i32
    %c0_i32_1 = arith.constant 0 : i32
    return %c0_i32, %c0_i32_0 : i32, i32
  }
  func.func @transform_3(%arg0: i32, %arg1: i32, %arg2: memref<1xf32, #tpu.memory_space<smem>>) -> (i32, i32) {
    %c0_i32 = arith.constant 0 : i32
    %c0_i32_0 = arith.constant 0 : i32
    %c0_i32_1 = arith.constant 0 : i32
    return %c0_i32, %c0_i32_0 : i32, i32
  }
  func.func @transform_4(%arg0: i32, %arg1: i32, %arg2: memref<1xf32, #tpu.memory_space<smem>>) -> (i32, i32) {
    %c0_i32 = arith.constant 0 : i32
    %c0_i32_0 = arith.constant 0 : i32
    %c0_i32_1 = arith.constant 0 : i32
    return %c0_i32, %c0_i32_0 : i32, i32
  }
  func.func @transform_5(%arg0: i32, %arg1: i32, %arg2: memref<1xf32, #tpu.memory_space<smem>>) -> (i32, i32) {
    %c0_i32 = arith.constant 0 : i32
    %c0_i32_0 = arith.constant 0 : i32
    return %c0_i32, %arg1 : i32, i32
  }
  func.func @transform_6(%arg0: i32, %arg1: i32, %arg2: memref<1xf32, #tpu.memory_space<smem>>) -> (i32, i32) {
    %c0_i32 = arith.constant 0 : i32
    return %arg0, %arg1 : i32, i32
  }
}

module attributes {stable_mosaic.version = 11 : i64} {
  func.func @_adapter_kernel(%arg0: i32, %arg1: i32, %arg2: memref<1xf32, #tpu.memory_space<smem>>, %arg3: memref<16x32xf32, #tpu.memory_space<vmem>>, %arg4: memref<32x128xf32, #tpu.memory_space<vmem>>, %arg5: memref<1x128xf32, #tpu.memory_space<vmem>>, %arg6: memref<128x32xf32, #tpu.memory_space<vmem>>, %arg7: memref<1x32xf32, #tpu.memory_space<vmem>>, %arg8: memref<32x128xf32, #tpu.memory_space<vmem>>, %arg9: memref<16x128xf32, #tpu.memory_space<vmem>>, %arg10: memref<16x32xf32, #tpu.memory_space<vmem>>) attributes {dimension_semantics = [#tpu.dimension_semantics<parallel>, #tpu.dimension_semantics<arbitrary>], iteration_bounds = array<i64: 3, 2>, scalar_prefetch = 1 : i64, scratch_operands = 1 : i64, tpu.core_type = #tpu.core_type<tc>, window_params = [{transform_indices = @transform_0, window_bounds = array<i64: 16, 32>}, {pipeline_mode = #tpu.pipeline_mode<synchronous>, transform_indices = @transform_1, window_bounds = array<i64: 32, 128>}, {pipeline_mode = #tpu.pipeline_mode<synchronous>, transform_indices = @transform_2, window_bounds = array<i64: 1, 128>}, {pipeline_mode = #tpu.pipeline_mode<synchronous>, transform_indices = @transform_3, window_bounds = array<i64: 128, 32>}, {pipeline_mode = #tpu.pipeline_mode<synchronous>, transform_indices = @transform_4, window_bounds = array<i64: 1, 32>}, {transform_indices = @transform_5, window_bounds = array<i64: 32, 128>}, {transform_indices = @transform_6, window_bounds = array<i64: 16, 128>}]} {
    %c0_i32 = arith.constant 0 : i32
    %0 = arith.cmpi eq, %arg1, %c0_i32 : i32
    %1 = arith.extui %0 : i1 to i32
    %c0_i32_0 = arith.constant 0 : i32
    %2 = arith.cmpi ne, %1, %c0_i32_0 : i32
    scf.if %2 {
      %c0_6 = arith.constant 0 : index
      %7 = memref.load %arg2[%c0_6] : memref<1xf32, #tpu.memory_space<smem>>
      %c0_7 = arith.constant 0 : index
      %c0_8 = arith.constant 0 : index
      %8 = vector.load %arg3[%c0_7, %c0_8] : memref<16x32xf32, #tpu.memory_space<vmem>>, vector<16x32xf32>
      %c0_9 = arith.constant 0 : index
      %c0_10 = arith.constant 0 : index
      %9 = vector.load %arg4[%c0_9, %c0_10] : memref<32x128xf32, #tpu.memory_space<vmem>>, vector<32x128xf32>
      %cst_11 = arith.constant dense<0.000000e+00> : vector<16x128xf32>
      %10 = tpu.matmul %8, %9, %cst_11 {dimension_numbers = #tpu.dot_dimension_numbers<[1], [0], [0], [1], [0, 0, 1, 1], [], []>} : vector<16x32xf32>, vector<32x128xf32>, vector<16x128xf32> -> vector<16x128xf32>
      %c0_12 = arith.constant 0 : index
      %c0_13 = arith.constant 0 : index
      %11 = vector.load %arg5[%c0_12, %c0_13] : memref<1x128xf32, #tpu.memory_space<vmem>>, vector<1x128xf32>
      %12 = vector.broadcast %11 : vector<1x128xf32> to vector<16x128xf32>
      %13 = arith.addf %10, %12 : vector<16x128xf32>
      %cst_14 = arith.constant 0.000000e+00 : f32
      %14 = vector.broadcast %cst_14 : f32 to vector<16x128xf32>
      %15 = arith.maximumf %13, %14 : vector<16x128xf32>
      %c0_15 = arith.constant 0 : index
      %c0_16 = arith.constant 0 : index
      %16 = vector.load %arg6[%c0_15, %c0_16] : memref<128x32xf32, #tpu.memory_space<vmem>>, vector<128x32xf32>
      %cst_17 = arith.constant dense<0.000000e+00> : vector<16x32xf32>
      %17 = tpu.matmul %15, %16, %cst_17 {dimension_numbers = #tpu.dot_dimension_numbers<[1], [0], [0], [1], [0, 0, 1, 1], [], []>} : vector<16x128xf32>, vector<128x32xf32>, vector<16x32xf32> -> vector<16x32xf32>
      %c0_18 = arith.constant 0 : index
      %c0_19 = arith.constant 0 : index
      %18 = vector.load %arg7[%c0_18, %c0_19] : memref<1x32xf32, #tpu.memory_space<vmem>>, vector<1x32xf32>
      %19 = vector.broadcast %18 : vector<1x32xf32> to vector<16x32xf32>
      %20 = arith.addf %17, %19 : vector<16x32xf32>
      %21 = vector.broadcast %7 : f32 to vector<16x32xf32>
      %22 = arith.mulf %21, %20 : vector<16x32xf32>
      %cst_20 = arith.constant 1.000000e+00 : f32
      %23 = arith.subf %cst_20, %7 : f32
      %24 = vector.broadcast %23 : f32 to vector<16x32xf32>
      %25 = arith.mulf %24, %8 : vector<16x32xf32>
      %26 = arith.addf %22, %25 : vector<16x32xf32>
      %27 = arith.mulf %26, %26 : vector<16x32xf32>
      %cst_21 = arith.constant dense<0.000000e+00> : vector<16xf32>
      %28 = vector.multi_reduction <add>, %27, %cst_21 [1] : vector<16x32xf32> to vector<16xf32>
      %29 = vector.shape_cast %28 : vector<16xf32> to vector<16x1xf32>
      %cst_22 = arith.constant 9.99999996E-13 : f32
      %30 = vector.broadcast %cst_22 : f32 to vector<16x1xf32>
      %31 = arith.addf %29, %30 : vector<16x1xf32>
      %32 = math.rsqrt %31 : vector<16x1xf32>
      %33 = vector.broadcast %32 : vector<16x1xf32> to vector<16x32xf32>
      %34 = arith.mulf %26, %33 : vector<16x32xf32>
      %c0_23 = arith.constant 0 : index
      %c0_24 = arith.constant 0 : index
      %35 = vector.load %arg10[%c0_23, %c0_24] : memref<16x32xf32, #tpu.memory_space<vmem>>, vector<16x32xf32>
      tpu.vector_store %arg10[%c0_23, %c0_24], %34 {strides = array<i32>} : memref<16x32xf32, #tpu.memory_space<vmem>>, vector<16x32xf32>,
    } else {
    }
    %c0 = arith.constant 0 : index
    %c0_1 = arith.constant 0 : index
    %3 = vector.load %arg10[%c0, %c0_1] : memref<16x32xf32, #tpu.memory_space<vmem>>, vector<16x32xf32>
    %c0_2 = arith.constant 0 : index
    %c0_3 = arith.constant 0 : index
    %4 = vector.load %arg8[%c0_2, %c0_3] : memref<32x128xf32, #tpu.memory_space<vmem>>, vector<32x128xf32>
    %cst = arith.constant dense<0.000000e+00> : vector<16x128xf32>
    %5 = tpu.matmul %3, %4, %cst {dimension_numbers = #tpu.dot_dimension_numbers<[1], [0], [0], [1], [0, 0, 1, 1], [], []>} : vector<16x32xf32>, vector<32x128xf32>, vector<16x128xf32> -> vector<16x128xf32>
    %c0_4 = arith.constant 0 : index
    %c0_5 = arith.constant 0 : index
    %6 = vector.load %arg9[%c0_4, %c0_5] : memref<16x128xf32, #tpu.memory_space<vmem>>, vector<16x128xf32>
    tpu.vector_store %arg9[%c0_4, %c0_5], %5 {strides = array<i32>} : memref<16x128xf32, #tpu.memory_space<vmem>>, vector<16x128xf32>,
    return
  }
  func.func @transform_0(%arg0: i32, %arg1: i32, %arg2: memref<1xf32, #tpu.memory_space<smem>>) -> (i32, i32) {
    %c0_i32 = arith.constant 0 : i32
    %c0_i32_0 = arith.constant 0 : i32
    return %arg0, %c0_i32 : i32, i32
  }
  func.func @transform_1(%arg0: i32, %arg1: i32, %arg2: memref<1xf32, #tpu.memory_space<smem>>) -> (i32, i32) {
    %c0_i32 = arith.constant 0 : i32
    %c0_i32_0 = arith.constant 0 : i32
    %c0_i32_1 = arith.constant 0 : i32
    return %c0_i32, %c0_i32_0 : i32, i32
  }
  func.func @transform_2(%arg0: i32, %arg1: i32, %arg2: memref<1xf32, #tpu.memory_space<smem>>) -> (i32, i32) {
    %c0_i32 = arith.constant 0 : i32
    %c0_i32_0 = arith.constant 0 : i32
    %c0_i32_1 = arith.constant 0 : i32
    return %c0_i32, %c0_i32_0 : i32, i32
  }
  func.func @transform_3(%arg0: i32, %arg1: i32, %arg2: memref<1xf32, #tpu.memory_space<smem>>) -> (i32, i32) {
    %c0_i32 = arith.constant 0 : i32
    %c0_i32_0 = arith.constant 0 : i32
    %c0_i32_1 = arith.constant 0 : i32
    return %c0_i32, %c0_i32_0 : i32, i32
  }
  func.func @transform_4(%arg0: i32, %arg1: i32, %arg2: memref<1xf32, #tpu.memory_space<smem>>) -> (i32, i32) {
    %c0_i32 = arith.constant 0 : i32
    %c0_i32_0 = arith.constant 0 : i32
    %c0_i32_1 = arith.constant 0 : i32
    return %c0_i32, %c0_i32_0 : i32, i32
  }
  func.func @transform_5(%arg0: i32, %arg1: i32, %arg2: memref<1xf32, #tpu.memory_space<smem>>) -> (i32, i32) {
    %c0_i32 = arith.constant 0 : i32
    %c0_i32_0 = arith.constant 0 : i32
    return %c0_i32, %arg1 : i32, i32
  }
  func.func @transform_6(%arg0: i32, %arg1: i32, %arg2: memref<1xf32, #tpu.memory_space<smem>>) -> (i32, i32) {
    %c0_i32 = arith.constant 0 : i32
    return %arg0, %arg1 : i32, i32
  }
}

</mosaic_0001>

<bundles_post_ra>
// kernel: tpu_custom_call.1
= control target key start
LH: loop header
LB: loop body
LE: loop exit
PB: predicated region body
PF: predicated region fallthrough
CT: control target
= control target key end

     0   :  { %s1437_s0 = inlined_call_operand.<no memory space> [shape: f32[1], index: 0, kind: input, shape index: {}]   ;;  %s1438_s1 = inlined_call_operand.vmem [shape: f32[48,32], index: 1, kind: input, shape index: {}]   ;;  %s1439_s2 = inlined_call_operand.vmem [shape: f32[32,128], index: 2, kind: input, shape index: {}]   ;;  %s1440_s3 = inlined_call_operand.vmem [shape: f32[1,128], index: 3, kind: input, shape index: {}]   ;;  %s1441_s4 = inlined_call_operand.vmem [shape: f32[128,32], index: 4, kind: input, shape index: {}]   ;;  %s1442_s5 = inlined_call_operand.vmem [shape: f32[1,32], index: 5, kind: input, shape index: {}]   ;;  %s1443_s6 = inlined_call_operand.vmem [shape: f32[32,256], index: 6, kind: input, shape index: {}]   ;;  %s1444_s7 = inlined_call_operand.hbm [shape: f32[48,256], index: 7, kind: output, shape index: {}]  }
   0x1   :  { %1450 = sst [smem:[#allocation13_spill]] %s1443_s6 }
   0x2   :  { %12 = sst [smem:[#allocation4]] %s1437_s0 }
   0x3   :  { %13 = vsyncpa [#allocation7], 0 }
   0x4   :  { %15 = vsyncpa [#allocation7 + $0x1], 0  ;;  %s1172_s26 = smov 0   ;;  %s1174_s27 = smov 0  }
   0x5   :  { %s1176_s28 = smov 0   ;;  %s1178_s29 = smov 0  }
   0x6   :  { %s1180_s30 = smov 0   ;;  %s1182_s8 = smov 0  }
   0x7   :  { %s1184_s9 = smov 0   ;;  %s1186_s10 = smov 0  }
   0x8   :  { %s1188_s11 = smov 0   ;;  %s1190_s0 = smov 0  }
   0x9 LB: > { %1451 = sst [smem:[#allocation9_spill]] %s1115_s10  ;;  %s759_s12 = sadd.s32 4294967295, %s1123_s0   ;;  %s1123_s0 = sphi %s1190_s0, %s21_s0   ;;  %s1119_s11 = sphi %s1188_s11, %s1463_s11   ;;  %s1115_s10 = sphi %s1186_s10, %s1462_s10   ;;  %s1111_s9 = sphi %s1184_s9, %s1461_s9   ;;  %s1107_s8 = sphi %s1182_s8, %s1460_s8   ;;  %s1103_s30 = sphi %s1180_s30, %s1468_s30   ;;  %s1099_s29 = sphi %s1178_s29, %s1467_s29   ;;  %s1095_s28 = sphi %s1176_s28, %s1466_s28   ;;  %s1091_s27 = sphi %s1174_s27, %s1465_s27   ;;  %s1087_s26 = sphi %s1172_s26, %s1464_s26  }
   0xa   : > { %1452 = sst [smem:[#allocation10_spill]] %s1119_s11  ;;  %s760_s13 = sadd.s32 4294967294, %s1123_s0  }
   0xb   : > { %s30_s14 = sadd.s32 1, %s1115_s10  ;;  %s33_s15 = sadd.s32 1, %s1119_s11 }
   0xc   : > { %p31_p0 = scmp.ge.s32.totalorder %s30_s14, 2  ;;  %s150_s16 = sadd.s32 1, %s1103_s30 }
   0xd   : > { %p157_p1 = scmp.ne.s32.totalorder %s1103_s30, %s1099_s29  ;;  %p158_p2 = scmp.eq.s32.totalorder %s1123_s0, 0 }
   0xe   : > { %s1470_s14 = smov (%p31_p0, %s30_s14), 0  ;;  %s1472_s15 = smov (!%p31_p0, %s33_s15), %s1119_s11 }
   0xf   : > { %1453 = sst [smem:[#allocation11_spill]] %s1470_s14  ;;  %s147_s17 = ssub.s32 %s1115_s10, %s1470_s14 }
  0x10   : > { %p1235_p3 = por %p158_p2, %p157_p1  ;;  %p35_p4 = scmp.ge.s32.totalorder %s1472_s15, 3 }
  0x11   : > { %p148_p5 = scmp.eq.s32.totalorder %s147_s17, 0  ;;  %s178_s19 = sadd.s32 1, %s1095_s28 }
  0x12   : > { %p188_p6 = scmp.ne.s32.totalorder %s1095_s28, %s1091_s27  ;;  %s1474_s15 = smov (%p35_p4, %s1472_s15), 0 }
  0x13   : > { %1455 = sst [smem:[#allocation12_spill]] %s1474_s15  ;;  %s173_s21 = ssub.s32 %s1119_s11, %s1474_s15 }
  0x14   : > { %s1245_s20 = scalar_select %p148_p5, %s1103_s30, %s150_s16  }
  0x15   : > { %p189_p7 = scmp.eq.s32.totalorder %s759_s12, 5  ;;  %s175_s22 = sor.u32 %s173_s21, %s147_s17 }
  0x16   : > { %p194_p8 = scmp.ne.s32.totalorder %s1091_s27, %s1087_s26  ;;  %p176_p9 = scmp.eq.s32.totalorder %s175_s22, 0 }
  0x17   : > { %p1251_p10 = por %p189_p7, %p188_p6  ;;  %p195_p11 = scmp.eq.s32.totalorder %s760_s13, 5 }
  0x18   : > { %s1256_s24 = scalar_select %p176_p9, %s1095_s28, %s178_s19  }
  0x19   : > { %p1258_p12 = por %p195_p11, %p194_p8  ;;  %p762_p13 = scmp.ge.s32.totalorder %s1123_s0, 6 }
  0x1b   : > { %223 = sbr.rel (%p762_p13) target bundleno = 46 (0x2e), region = 32 }
  0x22   : > { %235 = sbr.rel (!%p1235_p3) target bundleno = 46 (0x2e), region = 40  ;;  %s237_s12 = sand.u32 (%p1235_p3), 1, %s1103_s30  }
  0x23   : > { %s764_s16 = sshll.u32 (%p1235_p3), %s1115_s10, 3  ;;  %s763_s17 = sshll.u32 (%p1235_p3), %s237_s12, 5 }
  0x24   : > { %s1458_s6 = sld [smem:[#allocation13_spill]] (%p1235_p3)  ;;  %s239_s19 = scalar_lea.vmem (%p1235_p3), [#allocation5], %s763_s17 }
  0x2a   : > { %s241_s13 = scalar_lea.vmem %s1458_s6, %s764_s16 }
  0x2b   : > { %v275_v0 = vld [vmem:[%s241_s13] sm:$0xff]  ;;  %v277_v1 = vld [vmem:[%s241_s13 + $0x10] sm:$0xff] }
  0x2c   : > { %v279_v2 = vld [vmem:[%s241_s13 + $0x20] sm:$0xff]  ;;  %276 = vst [vmem:[%s239_s19] sm:$0xff] %v275_v0  ;;  %278 = vst [vmem:[%s239_s19 + $0x8] sm:$0xff] %v277_v1  ;;  %v281_v3 = vld [vmem:[%s241_s13 + $0x30] sm:$0xff] }
  0x2d   : > { %280 = vst [vmem:[%s239_s19 + $0x10] sm:$0xff] %v279_v2  ;;  %282 = vst [vmem:[%s239_s19 + $0x18] sm:$0xff] %v281_v3 }
  0x2e PF: > { %p765_p0 = scmp.ge.s32.totalorder %s1123_s0, 1  ;;  %p287_p1 = scmp.lt.s32.totalorder %s1123_s0, 7 }
  0x30   : > { %p288_p2 = pnand %p765_p0, %p287_p1 }
  0x31   : > { %s294_s18 = sand.u32 (!%p288_p2), 1, %s1099_s29   ;;  %s1448_s12 = sand.u32 (!%p288_p2), 1, %s1091_s27  }
  0x32   : > { %291 = sbr.rel (%p288_p2) target bundleno = 911 (0x38f), region = 78  ;;  %s766_s16 = sshll.u32 (!%p288_p2), %s294_s18, 5 }
  0x33   : > { %s767_s17 = sshll.u32 (!%p288_p2), %s1448_s12, 4  ;;  %s768_s21 = sshll.u32 (!%p288_p2), %s1111_s9, 1 }
  0x34   : > { %p329_p3 = scmp.lt.s32.totalorder (!%p288_p2), %s768_s21, 5  ;;  %s1280_s15 = scalar_lea.vmem (!%p288_p2), [#allocation5], %s766_s16 }
  0x35   : > { %s1282_s14 = scalar_lea.vmem (!%p288_p2), [#allocation6], %s767_s17  ;;  %p770_p4 = scmp.ne.s32.totalorder (!%p288_p2), %s1107_s8, 0 }
  0x39   : > { %s1476_s21 = smov (!%p329_p3, %s768_s21), 5  ;;  %338 = sbr.rel (%p770_p4) target bundleno = 671 (0x29f), region = 86 }
  0x3a   : > { %s769_s22 = sshll.u32 %s1476_s21, 3  ;;  %v342_v4 = vld [vmem:[%s1439_s2] sm:$0xff] (!%p770_p4)  ;;  %v343_v5 = vld [vmem:[%s1439_s2 + $0x8] sm:$0xff] (!%p770_p4)  ;;  %v344_v6 = vld [vmem:[%s1439_s2 + $0x10] sm:$0xff] (!%p770_p4)  ;;  %vm353_vm0 = vcmask (!%p770_p4), 261120   ;;  %s339_s17 = sld [smem:[#allocation4]] (!%p770_p4) }
  0x3b   : > { %s332_s6 = scalar_lea.vmem %s1438_s1, %s769_s22  ;;  %v871_v7 = vpack.c.bf16 (!%p770_p4), %v343_v5, %v342_v4  ;;  %v345_v8 = vld [vmem:[%s1439_s2 + $0x18] sm:$0xff] (!%p770_p4)  ;;  %v437_v11 = vld [vmem:[%s1441_s4] sm:$0xff] (!%p770_p4)  ;;  %v438_v12 = vld [vmem:[%s1441_s4 + $0x8] sm:$0xff] (!%p770_p4) }
  0x3c   : > { %v1297_v9 = vld [vmem:[%s332_s6] sm:$0xff] (!%p770_p4)  ;;  %v875_v10 = vpack.c.bf16 (!%p770_p4), %v345_v8, %v344_v6  ;;  %v439_v13 = vld [vmem:[%s1441_s4 + $0x10] sm:$0xff] (!%p770_p4)  ;;  %v879_v14 = vpack.c.bf16 (!%p770_p4), %v438_v12, %v437_v11  ;;  %v440_v15 = vld [vmem:[%s1441_s4 + $0x18] sm:$0xff] (!%p770_p4) }
  0x3d   : > { %822 = vmatprep.mubr.msk.f32.mxu0 (!%p770_p4), %vm353_vm0, %v1297_v9  ;;  %872 = vmatprep.subr.bf16.mxu0 (!%p770_p4), %v871_v7  ;;  %v883_v16 = vpack.c.bf16 (!%p770_p4), %v440_v15, %v439_v13  ;;  %v441_v17 = vld [vmem:[%s1441_s4 + $0x20] sm:$0xff] (!%p770_p4)  ;;  %v442_v18 = vld [vmem:[%s1441_s4 + $0x28] sm:$0xff] (!%p770_p4)  ;;  %v443_v21 = vld [vmem:[%s1441_s4 + $0x30] sm:$0xff] (!%p770_p4) }
  0x3e   : > { %874 = vmatpush3.bf16.msra.mxu0 (!%p770_p4), %v871_v7  ;;  %880 = vmatprep.subr.bf16.mxu1 (!%p770_p4), %v879_v14  ;;  %v887_v19 = vpack.c.bf16 (!%p770_p4), %v442_v18, %v441_v17  ;;  %v341_v20 = vld [vmem:[%s332_s6 + $0x8] sm:$0xff] (!%p770_p4)  ;;  %v444_v22 = vld [vmem:[%s1441_s4 + $0x38] sm:$0xff] (!%p770_p4)  ;;  %v445_v24 = vld [vmem:[%s1441_s4 + $0x40] sm:$0xff] (!%p770_p4) }
  0x3f   : > { %876 = vmatprep.subr.bf16.mxu0 (!%p770_p4), %v875_v10  ;;  %882 = vmatpush3.bf16.msra.mxu1 (!%p770_p4), %v879_v14  ;;  %v891_v23 = vpack.c.bf16 (!%p770_p4), %v444_v22, %v443_v21  ;;  %v446_v25 = vld [vmem:[%s1441_s4 + $0x48] sm:$0xff] (!%p770_p4)  ;;  %v447_v27 = vld [vmem:[%s1441_s4 + $0x50] sm:$0xff] (!%p770_p4)  ;;  %v448_v28 = vld [vmem:[%s1441_s4 + $0x58] sm:$0xff] (!%p770_p4) }
  0x40   : > { %884 = vmatprep.subr.bf16.mxu1 %v883_v16  ;;  %v895_v26 = vpack.c.bf16 %v446_v25, %v445_v24  ;;  %v899_v29 = vpack.c.bf16 %v448_v28, %v447_v27  ;;  %v449_v30 = vld [vmem:[%s1441_s4 + $0x60] sm:$0xff]  ;;  %v450_v31 = vld [vmem:[%s1441_s4 + $0x68] sm:$0xff]  ;;  %v451_v33 = vld [vmem:[%s1441_s4 + $0x70] sm:$0xff]  ;;  %s538_s11 = ssub.f32 1.0, %s339_s17  ;;  %v535_v46 = vstv %s339_s17 }
  0x41   : > { %v903_v32 = vpack.c.bf16 %v450_v31, %v449_v30  ;;  %v452_v34 = vld [vmem:[%s1441_s4 + $0x78] sm:$0xff]  ;;  %v771_v36 = vld [vmem:[%s1440_s3] ss:$0 sm:$0xff] }
  0x42   : > { %878 = vmatpush3.bf16.msra.mxu0 %v875_v10  ;;  %v907_v35 = vpack.c.bf16 %v452_v34, %v451_v33  ;;  %v539_v43 = vstv %s538_s11  ;;  %v774_v44 = vld [vmem:[%s1442_s5] ss:$0 sm:$0xff] }
  0x43   : > { %886 = vmatpush3.bf16.msra.mxu1 %v883_v16  ;;  %v541_v47 = vmul.f32 %v539_v43, %v341_v20  ;;  %v540_v50 = vmul.f32 %v539_v43, %v1297_v9 }
  0x44   : > { %888 = vmatprep.subr.bf16.mxu1 %v887_v19 }
  0x45   : > { %823 = vmatmul.mubr.msk.f32.vlgmr.msra.gmra.mrb[0].mxu0 %vm353_vm0, %v341_v20 }
  0x47   : > { %890 = vmatpush3.bf16.msra.mxu1 %v887_v19 }
  0x48   : > { %892 = vmatprep.subr.bf16.mxu1 %v891_v23 }
  0x4b   : > { %894 = vmatpush3.bf16.msra.mxu1 %v891_v23 }
  0x4c   : > { %896 = vmatprep.subr.bf16.mxu1 %v895_v26 }
  0x4f   : > { %898 = vmatpush3.bf16.msra.mxu1 %v895_v26 }
  0x50   : > { %900 = vmatprep.subr.bf16.mxu1 %v899_v29 }
  0x53   : > { %902 = vmatpush3.bf16.msra.mxu1 %v899_v29 }
  0x54   : > { %904 = vmatprep.subr.bf16.mxu1 %v903_v32 }
  0x57   : > { %906 = vmatpush3.bf16.msra.mxu1 %v903_v32 }
  0x58   : > { %908 = vmatprep.subr.bf16.mxu1 %v907_v35 }
  0x5b   : > { %910 = vmatpush3.bf16.msra.mxu1 %v907_v35 }
 0x118   : > { %v824_v37 = vpop.f32.mrb[0].mxu0 }
 0x119   : > { %v432_v38 = vadd.f32 %v824_v37, %v771_v36  ;;  %v426_v39 = vpop.f32.mrb[1].mxu0 }
 0x11a   : > { %v427_v40 = vadd.f32 %v771_v36, %v426_v39 }
 0x11b   : > { %v436_v42 = vmax.f32 %v432_v38, 0.0 }
 0x11c   : > { %v435_v41 = vmax.f32 %v427_v40, 0.0 }
 0x11e   : > { %857 = vmatprep.mubr.f32.mxu1 %v435_v41 }
 0x11f   : > { %858 = vmatmul.mubr.f32.vlgmr.msra.gmra.mrb[0].mxu1 %v436_v42 }
 0x1f2   : > { %v859_v45 = vpop.f32.mrb[0].mxu1 }
 0x1f3   : > { %v532_v48 = vadd.f32 %v859_v45, %v774_v44  ;;  %v526_v49 = vpop.f32.mrb[1].mxu1 }
 0x1f4   : > { %v527_v51 = vadd.f32 %v774_v44, %v526_v49 }
 0x1f5   : > { %v537_v52 = vmul.f32 %v535_v46, %v532_v48 }
 0x1f6   : > { %v536_v53 = vmul.f32 %v535_v46, %v527_v51 }
 0x1f7   : > { %v543_v54 = vadd.f32 %v541_v47, %v537_v52 }
 0x1f8   : > { %v542_v55 = vadd.f32 %v540_v50, %v536_v53 }
 0x1f9   : > { %v545_v58 = vmul.f32 %v543_v54, %v543_v54 }
 0x1fa   : > { %v544_v56 = vmul.f32 %v542_v55, %v542_v55 }
 0x1fb   : > { %v549_v59 = vsel %vm353_vm0, %v545_v58, 0.0 }
 0x1fc   : > { %v546_v57 = vsel %vm353_vm0, %v544_v56, 0.0 }
 0x1fd   : > { %547 = vadd.xlane.f32.xlu0 %v546_v57 }
 0x201   : > { %550 = vadd.xlane.f32.xlu0 %v549_v59 }
 0x28a   : > { %v548_v60 = vpop.xlane.xlu0 %547 }
 0x28b   : > { %v552_v61 = vadd.f32 1e-12, %v548_v60 }
 0x28d   : > { %1009 = vrsqrt.f32 %v552_v61 }
 0x28e   : > { %v551_v62 = vpop.xlane.xlu0 %550 }
 0x28f   : > { %v553_v63 = vadd.f32 1e-12, %v551_v62 }
 0x291   : > { %1011 = vrsqrt.f32 %v553_v63 }
 0x297   : > { %v1010_v0 = vpop.eup %1009 }
 0x298   : > { %v556_v1 = vmul.f32 %v1010_v0, %v542_v55 }
 0x29a   : > { %558 = vst.msk [vmem:[#allocation2] sm:$0xff] %vm353_vm0, %v556_v1 }
 0x29b   : > { %v1012_v2 = vpop.eup %1011 }
 0x29c   : > { %v557_v3 = vmul.f32 %v1012_v2, %v543_v54 }
 0x29e   : > { %559 = vst.msk [vmem:[#allocation2 + $0x8] sm:$0xff] %vm353_vm0, %v557_v3 }
 0x29f PF: > { %v562_v4 = vld [vmem:[%s1280_s15] sm:$0xff]  ;;  %v563_v5 = vld [vmem:[%s1280_s15 + $0x8] sm:$0xff]  ;;  %v564_v6 = vld [vmem:[%s1280_s15 + $0x10] sm:$0xff]  ;;  %vm566_vm1 = vcmask 261120   ;;  %s783_s13 = sshll.u32 %s1111_s9, 2  ;;  %s666_s29 = sshll.u32 %s1282_s14, 4  ;;  %s1373_s29 = int_to_ptr.vmem [resolvable:$true] %s666_s29 }
 0x2a0   : > { %v911_v7 = vpack.c.bf16 %v563_v5, %v562_v4  ;;  %v565_v8 = vld [vmem:[%s1280_s15 + $0x18] sm:$0xff]  ;;  %s663_s10 = sadd.s32 %s1107_s8, %s783_s13  ;;  %s1459_s6 = sand.u32 1, %s1091_s27  }
 0x2a1   : > { %v560_v9 = vld [vmem:[#allocation2] sm:$0xff]  ;;  %v915_v10 = vpack.c.bf16 %v565_v8, %v564_v6  ;;  %s780_s19 = sshll.u32 %s663_s10, 7  ;;  %s1379_s16 = scalar_lea.sflag [#allocation7], %s1459_s6 }
 0x2a2   : > { %868 = vmatprep.mubr.msk.f32.mxu0 %vm566_vm1, %v560_v9  ;;  %912 = vmatprep.subr.bf16.mxu0 %v911_v7  ;;  %s1371_s15 = scalar_lea.hbm %s1444_s7, %s780_s19  ;;  %s1013_s8 = scalar_lea.vmem %s1373_s29, 256 }
 0x2a3   : > { %914 = vmatpush3.bf16.msra.mxu0 %v911_v7  ;;  %p1014_p5 = scmp.ne.s32.totalorder %s1373_s29, %s1013_s8  ;;  %s1125_s9 = smov [#allocation6]  }
 0x2a4   : > { %916 = vmatprep.subr.bf16.mxu0 %v915_v10  ;;  %s1017_s17 = sshll.u32 %s1125_s9, 4  ;;  %s1018_s17 = int_to_ptr.vmem [resolvable:$false] %s1017_s17 }
 0x2a5   : > { %v561_v11 = vld [vmem:[#allocation2 + $0x8] sm:$0xff]  ;;  %p1015_p6 = pnand %p1014_p5, %p1251_p10  ;;  %s1019_s11 = scalar_lea.vmem %s1018_s17, 512 }
 0x2a6   : > { %p1020_p8 = scmp.lt.s32.totalorder %s1373_s29, %s1018_s17  ;;  %p1021_p9 = scmp.lt.s32.totalorder %s1019_s11, %s1013_s8 }
 0x2a7   : > { %918 = vmatpush3.bf16.msra.mxu0 %v915_v10  ;;  %p1016_p7 = pneg %p1015_p6 }
 0x2a8   : > { %p1022_p11 = por %p1021_p9, %p1020_p8 }
 0x2aa   : > { %869 = vmatmul.mubr.msk.f32.vlgmr.msra.gmra.mrb[0].mxu0 %vm566_vm1, %v561_v11  ;;  %p1023_p13 = pnand %p1022_p11, %p1016_p7 }
 0x37d   : > { %v870_v12 = vpop.f32.mrb[0].mxu0 }
 0x37e   : > { %649 = vst [vmem:[%s1282_s14 + $0x8] sm:$0xff] %v870_v12  ;;  %v639_v13 = vpop.f32.mrb[1].mxu0 }
 0x37f   : > { %648 = vst [vmem:[%s1282_s14] sm:$0xff] %v639_v13 }
 0x380   : > { %1026 = shalt.err (!%p1023_p13)
}
 0x381   : > { %s1027_s14 = scalar_lea.hbm %s1371_s15, 256  ;;  %s1031_s13 = scalar_lea.hbm %s1444_s7, 1536 }
 0x382   : > { %p1028_p0 = scmp.ne.s32.totalorder %s1371_s15, %s1027_s14  ;;  %p1032_p3 = scmp.lt.u32.totalorder %s1371_s15, %s1444_s7 }
 0x383   : > { %p1033_p4 = scmp.lt.u32.totalorder %s1031_s13, %s1027_s14  ;;  %p1035_p6 = scmp.lt.u32.totalorder %s1027_s14, %s1371_s15 }
 0x384   : > { %p1029_p1 = pnand %p1028_p0, %p1251_p10 }
 0x385   : > { %p1034_p5 = por %p1033_p4, %p1032_p3 }
 0x386   : > { %p1030_p2 = pneg %p1029_p1 }
 0x387   : > { %p1036_p7 = por %p1035_p6, %p1034_p5 }
 0x389   : > { %p1037_p8 = pnand %p1036_p7, %p1030_p2 }
 0x38b   : > { %1040 = shalt.err (!%p1037_p8)
}
 0x38c   : > { %s1126_s18 = smov 128   ;;  %s1127_s21 = smov 256  }
 0x38d   : > { %s1128_s6 = smov 8  }
 0x38e   : > { %919 = dma.vmem_to_hbm [thread:$0]  (%p1251_p10), %s1373_s29, 256, %s1371_s15, %s1379_s16, %s1126_s18, %s1127_s21, %s1128_s6  }
 0x38f PF: > { %p925_p9 = scmp.ge.s32.totalorder %s1123_s0, 2  ;;  %s681_s8 = sand.u32 1, %s1087_s26  }
 0x390   : > { %s682_s9 = scalar_lea.sflag [#allocation7], %s681_s8 }
 0x391   : > { %p922_p11 = pnand %p925_p9, %p1258_p12 }
 0x393   : > { %1082 = dma.done.wait (!%p922_p11), %s682_s9, 256  }
 0x394   : > { %1084 = vsyncadd (!%p922_p11), %s682_s9, 4294967040  ;;  %s21_s0 = sadd.s32 1, %s1123_s0   ;;  %s1460_s8 = sld [smem:[#allocation9_spill]] }
 0x395   : > { %p18_p13 = scmp.ge.s32.totalorder %s21_s0, 8   ;;  %s1461_s9 = sld [smem:[#allocation10_spill]] }
 0x396   : > { %s1462_s10 = sld [smem:[#allocation11_spill]]  ;;  %s1463_s11 = sld [smem:[#allocation12_spill]] }
 0x397   : > { %s1464_s26 = smov %s1091_s27  ;;  %s1465_s27 = smov %s1095_s28 }
 0x398   : > { %s1466_s28 = smov %s1256_s24  ;;  %s1467_s29 = smov %s1103_s30 }
 0x399   : > { %s1468_s30 = smov %s1245_s20  ;;  %20 = sbr.rel (!%p18_p13) target bundleno = 9 (0x9), region = 129 }
 0x3a0   :  { %687 = vsyncpa [#allocation7], 1 }
 0x3a1   :  { %689 = vsyncpa [#allocation7 + $0x1], 1 }

// kernel: tpu_custom_call.1
= control target key start
LH: loop header
LB: loop body
LE: loop exit
PB: predicated region body
PF: predicated region fallthrough
CT: control target
= control target key end

     0   :  { %s1437_s0 = inlined_call_operand.<no memory space> [shape: f32[1], index: 0, kind: input, shape index: {}]   ;;  %s1438_s1 = inlined_call_operand.vmem [shape: f32[48,32], index: 1, kind: input, shape index: {}]   ;;  %s1439_s2 = inlined_call_operand.vmem [shape: f32[32,128], index: 2, kind: input, shape index: {}]   ;;  %s1440_s3 = inlined_call_operand.vmem [shape: f32[1,128], index: 3, kind: input, shape index: {}]   ;;  %s1441_s4 = inlined_call_operand.vmem [shape: f32[128,32], index: 4, kind: input, shape index: {}]   ;;  %s1442_s5 = inlined_call_operand.vmem [shape: f32[1,32], index: 5, kind: input, shape index: {}]   ;;  %s1443_s6 = inlined_call_operand.vmem [shape: f32[32,256], index: 6, kind: input, shape index: {}]   ;;  %s1444_s7 = inlined_call_operand.hbm [shape: f32[48,256], index: 7, kind: output, shape index: {}]  }
   0x1   :  { %1450 = sst [smem:[#allocation13_spill]] %s1443_s6 }
   0x2   :  { %12 = sst [smem:[#allocation4]] %s1437_s0 }
   0x3   :  { %13 = vsyncpa [#allocation7], 0 }
   0x4   :  { %15 = vsyncpa [#allocation7 + $0x1], 0  ;;  %s1172_s26 = smov 0   ;;  %s1174_s27 = smov 0  }
   0x5   :  { %s1176_s28 = smov 0   ;;  %s1178_s29 = smov 0  }
   0x6   :  { %s1180_s30 = smov 0   ;;  %s1182_s8 = smov 0  }
   0x7   :  { %s1184_s9 = smov 0   ;;  %s1186_s10 = smov 0  }
   0x8   :  { %s1188_s11 = smov 0   ;;  %s1190_s0 = smov 0  }
   0x9 LB: > { %1451 = sst [smem:[#allocation9_spill]] %s1115_s10  ;;  %s759_s12 = sadd.s32 4294967295, %s1123_s0   ;;  %s1123_s0 = sphi %s1190_s0, %s21_s0   ;;  %s1119_s11 = sphi %s1188_s11, %s1463_s11   ;;  %s1115_s10 = sphi %s1186_s10, %s1462_s10   ;;  %s1111_s9 = sphi %s1184_s9, %s1461_s9   ;;  %s1107_s8 = sphi %s1182_s8, %s1460_s8   ;;  %s1103_s30 = sphi %s1180_s30, %s1468_s30   ;;  %s1099_s29 = sphi %s1178_s29, %s1467_s29   ;;  %s1095_s28 = sphi %s1176_s28, %s1466_s28   ;;  %s1091_s27 = sphi %s1174_s27, %s1465_s27   ;;  %s1087_s26 = sphi %s1172_s26, %s1464_s26  }
   0xa   : > { %1452 = sst [smem:[#allocation10_spill]] %s1119_s11  ;;  %s760_s13 = sadd.s32 4294967294, %s1123_s0  }
   0xb   : > { %s30_s14 = sadd.s32 1, %s1115_s10  ;;  %s33_s15 = sadd.s32 1, %s1119_s11 }
   0xc   : > { %p31_p0 = scmp.ge.s32.totalorder %s30_s14, 2  ;;  %s150_s16 = sadd.s32 1, %s1103_s30 }
   0xd   : > { %p157_p1 = scmp.ne.s32.totalorder %s1103_s30, %s1099_s29  ;;  %p158_p2 = scmp.eq.s32.totalorder %s1123_s0, 0 }
   0xe   : > { %s1470_s14 = smov (%p31_p0, %s30_s14), 0  ;;  %s1472_s15 = smov (!%p31_p0, %s33_s15), %s1119_s11 }
   0xf   : > { %1453 = sst [smem:[#allocation11_spill]] %s1470_s14  ;;  %s147_s17 = ssub.s32 %s1115_s10, %s1470_s14 }
  0x10   : > { %p1235_p3 = por %p158_p2, %p157_p1  ;;  %p35_p4 = scmp.ge.s32.totalorder %s1472_s15, 3 }
  0x11   : > { %p148_p5 = scmp.eq.s32.totalorder %s147_s17, 0  ;;  %s178_s19 = sadd.s32 1, %s1095_s28 }
  0x12   : > { %p188_p6 = scmp.ne.s32.totalorder %s1095_s28, %s1091_s27  ;;  %s1474_s15 = smov (%p35_p4, %s1472_s15), 0 }
  0x13   : > { %1455 = sst [smem:[#allocation12_spill]] %s1474_s15  ;;  %s173_s21 = ssub.s32 %s1119_s11, %s1474_s15 }
  0x14   : > { %s1245_s20 = scalar_select %p148_p5, %s1103_s30, %s150_s16  }
  0x15   : > { %p189_p7 = scmp.eq.s32.totalorder %s759_s12, 5  ;;  %s175_s22 = sor.u32 %s173_s21, %s147_s17 }
  0x16   : > { %p194_p8 = scmp.ne.s32.totalorder %s1091_s27, %s1087_s26  ;;  %p176_p9 = scmp.eq.s32.totalorder %s175_s22, 0 }
  0x17   : > { %p1251_p10 = por %p189_p7, %p188_p6  ;;  %p195_p11 = scmp.eq.s32.totalorder %s760_s13, 5 }
  0x18   : > { %s1256_s24 = scalar_select %p176_p9, %s1095_s28, %s178_s19  }
  0x19   : > { %p1258_p12 = por %p195_p11, %p194_p8  ;;  %p762_p13 = scmp.ge.s32.totalorder %s1123_s0, 6 }
  0x1b   : > { %223 = sbr.rel (%p762_p13) target bundleno = 46 (0x2e), region = 32 }
  0x22   : > { %235 = sbr.rel (!%p1235_p3) target bundleno = 46 (0x2e), region = 40  ;;  %s237_s12 = sand.u32 (%p1235_p3), 1, %s1103_s30  }
  0x23   : > { %s764_s16 = sshll.u32 (%p1235_p3), %s1115_s10, 3  ;;  %s763_s17 = sshll.u32 (%p1235_p3), %s237_s12, 5 }
  0x24   : > { %s1458_s6 = sld [smem:[#allocation13_spill]] (%p1235_p3)  ;;  %s239_s19 = scalar_lea.vmem (%p1235_p3), [#allocation5], %s763_s17 }
  0x2a   : > { %s241_s13 = scalar_lea.vmem %s1458_s6, %s764_s16 }
  0x2b   : > { %v275_v0 = vld [vmem:[%s241_s13] sm:$0xff]  ;;  %v277_v1 = vld [vmem:[%s241_s13 + $0x10] sm:$0xff] }
  0x2c   : > { %v279_v2 = vld [vmem:[%s241_s13 + $0x20] sm:$0xff]  ;;  %276 = vst [vmem:[%s239_s19] sm:$0xff] %v275_v0  ;;  %278 = vst [vmem:[%s239_s19 + $0x8] sm:$0xff] %v277_v1  ;;  %v281_v3 = vld [vmem:[%s241_s13 + $0x30] sm:$0xff] }
  0x2d   : > { %280 = vst [vmem:[%s239_s19 + $0x10] sm:$0xff] %v279_v2  ;;  %282 = vst [vmem:[%s239_s19 + $0x18] sm:$0xff] %v281_v3 }
  0x2e PF: > { %p765_p0 = scmp.ge.s32.totalorder %s1123_s0, 1  ;;  %p287_p1 = scmp.lt.s32.totalorder %s1123_s0, 7 }
  0x30   : > { %p288_p2 = pnand %p765_p0, %p287_p1 }
  0x31   : > { %s294_s18 = sand.u32 (!%p288_p2), 1, %s1099_s29   ;;  %s1448_s12 = sand.u32 (!%p288_p2), 1, %s1091_s27  }
  0x32   : > { %291 = sbr.rel (%p288_p2) target bundleno = 911 (0x38f), region = 78  ;;  %s766_s16 = sshll.u32 (!%p288_p2), %s294_s18, 5 }
  0x33   : > { %s767_s17 = sshll.u32 (!%p288_p2), %s1448_s12, 4  ;;  %s768_s21 = sshll.u32 (!%p288_p2), %s1111_s9, 1 }
  0x34   : > { %p329_p3 = scmp.lt.s32.totalorder (!%p288_p2), %s768_s21, 5  ;;  %s1280_s15 = scalar_lea.vmem (!%p288_p2), [#allocation5], %s766_s16 }
  0x35   : > { %s1282_s14 = scalar_lea.vmem (!%p288_p2), [#allocation6], %s767_s17  ;;  %p770_p4 = scmp.ne.s32.totalorder (!%p288_p2), %s1107_s8, 0 }
  0x39   : > { %s1476_s21 = smov (!%p329_p3, %s768_s21), 5  ;;  %338 = sbr.rel (%p770_p4) target bundleno = 671 (0x29f), region = 86 }
  0x3a   : > { %s769_s22 = sshll.u32 %s1476_s21, 3  ;;  %v342_v4 = vld [vmem:[%s1439_s2] sm:$0xff] (!%p770_p4)  ;;  %v343_v5 = vld [vmem:[%s1439_s2 + $0x8] sm:$0xff] (!%p770_p4)  ;;  %v344_v6 = vld [vmem:[%s1439_s2 + $0x10] sm:$0xff] (!%p770_p4)  ;;  %vm353_vm0 = vcmask (!%p770_p4), 261120   ;;  %s339_s17 = sld [smem:[#allocation4]] (!%p770_p4) }
  0x3b   : > { %s332_s6 = scalar_lea.vmem %s1438_s1, %s769_s22  ;;  %v871_v7 = vpack.c.bf16 (!%p770_p4), %v343_v5, %v342_v4  ;;  %v345_v8 = vld [vmem:[%s1439_s2 + $0x18] sm:$0xff] (!%p770_p4)  ;;  %v437_v11 = vld [vmem:[%s1441_s4] sm:$0xff] (!%p770_p4)  ;;  %v438_v12 = vld [vmem:[%s1441_s4 + $0x8] sm:$0xff] (!%p770_p4) }
  0x3c   : > { %v1297_v9 = vld [vmem:[%s332_s6] sm:$0xff] (!%p770_p4)  ;;  %v875_v10 = vpack.c.bf16 (!%p770_p4), %v345_v8, %v344_v6  ;;  %v439_v13 = vld [vmem:[%s1441_s4 + $0x10] sm:$0xff] (!%p770_p4)  ;;  %v879_v14 = vpack.c.bf16 (!%p770_p4), %v438_v12, %v437_v11  ;;  %v440_v15 = vld [vmem:[%s1441_s4 + $0x18] sm:$0xff] (!%p770_p4) }
  0x3d   : > { %822 = vmatprep.mubr.msk.f32.mxu0 (!%p770_p4), %vm353_vm0, %v1297_v9  ;;  %872 = vmatprep.subr.bf16.mxu0 (!%p770_p4), %v871_v7  ;;  %v883_v16 = vpack.c.bf16 (!%p770_p4), %v440_v15, %v439_v13  ;;  %v441_v17 = vld [vmem:[%s1441_s4 + $0x20] sm:$0xff] (!%p770_p4)  ;;  %v442_v18 = vld [vmem:[%s1441_s4 + $0x28] sm:$0xff] (!%p770_p4)  ;;  %v443_v21 = vld [vmem:[%s1441_s4 + $0x30] sm:$0xff] (!%p770_p4) }
  0x3e   : > { %874 = vmatpush3.bf16.msra.mxu0 (!%p770_p4), %v871_v7  ;;  %880 = vmatprep.subr.bf16.mxu1 (!%p770_p4), %v879_v14  ;;  %v887_v19 = vpack.c.bf16 (!%p770_p4), %v442_v18, %v441_v17  ;;  %v341_v20 = vld [vmem:[%s332_s6 + $0x8] sm:$0xff] (!%p770_p4)  ;;  %v444_v22 = vld [vmem:[%s1441_s4 + $0x38] sm:$0xff] (!%p770_p4)  ;;  %v445_v24 = vld [vmem:[%s1441_s4 + $0x40] sm:$0xff] (!%p770_p4) }
  0x3f   : > { %876 = vmatprep.subr.bf16.mxu0 (!%p770_p4), %v875_v10  ;;  %882 = vmatpush3.bf16.msra.mxu1 (!%p770_p4), %v879_v14  ;;  %v891_v23 = vpack.c.bf16 (!%p770_p4), %v444_v22, %v443_v21  ;;  %v446_v25 = vld [vmem:[%s1441_s4 + $0x48] sm:$0xff] (!%p770_p4)  ;;  %v447_v27 = vld [vmem:[%s1441_s4 + $0x50] sm:$0xff] (!%p770_p4)  ;;  %v448_v28 = vld [vmem:[%s1441_s4 + $0x58] sm:$0xff] (!%p770_p4) }
  0x40   : > { %884 = vmatprep.subr.bf16.mxu1 %v883_v16  ;;  %v895_v26 = vpack.c.bf16 %v446_v25, %v445_v24  ;;  %v899_v29 = vpack.c.bf16 %v448_v28, %v447_v27  ;;  %v449_v30 = vld [vmem:[%s1441_s4 + $0x60] sm:$0xff]  ;;  %v450_v31 = vld [vmem:[%s1441_s4 + $0x68] sm:$0xff]  ;;  %v451_v33 = vld [vmem:[%s1441_s4 + $0x70] sm:$0xff]  ;;  %s538_s11 = ssub.f32 1.0, %s339_s17  ;;  %v535_v46 = vstv %s339_s17 }
  0x41   : > { %v903_v32 = vpack.c.bf16 %v450_v31, %v449_v30  ;;  %v452_v34 = vld [vmem:[%s1441_s4 + $0x78] sm:$0xff]  ;;  %v771_v36 = vld [vmem:[%s1440_s3] ss:$0 sm:$0xff] }
  0x42   : > { %878 = vmatpush3.bf16.msra.mxu0 %v875_v10  ;;  %v907_v35 = vpack.c.bf16 %v452_v34, %v451_v33  ;;  %v539_v43 = vstv %s538_s11  ;;  %v774_v44 = vld [vmem:[%s1442_s5] ss:$0 sm:$0xff] }
  0x43   : > { %886 = vmatpush3.bf16.msra.mxu1 %v883_v16  ;;  %v541_v47 = vmul.f32 %v539_v43, %v341_v20  ;;  %v540_v50 = vmul.f32 %v539_v43, %v1297_v9 }
  0x44   : > { %888 = vmatprep.subr.bf16.mxu1 %v887_v19 }
  0x45   : > { %823 = vmatmul.mubr.msk.f32.vlgmr.msra.gmra.mrb[0].mxu0 %vm353_vm0, %v341_v20 }
  0x47   : > { %890 = vmatpush3.bf16.msra.mxu1 %v887_v19 }
  0x48   : > { %892 = vmatprep.subr.bf16.mxu1 %v891_v23 }
  0x4b   : > { %894 = vmatpush3.bf16.msra.mxu1 %v891_v23 }
  0x4c   : > { %896 = vmatprep.subr.bf16.mxu1 %v895_v26 }
  0x4f   : > { %898 = vmatpush3.bf16.msra.mxu1 %v895_v26 }
  0x50   : > { %900 = vmatprep.subr.bf16.mxu1 %v899_v29 }
  0x53   : > { %902 = vmatpush3.bf16.msra.mxu1 %v899_v29 }
  0x54   : > { %904 = vmatprep.subr.bf16.mxu1 %v903_v32 }
  0x57   : > { %906 = vmatpush3.bf16.msra.mxu1 %v903_v32 }
  0x58   : > { %908 = vmatprep.subr.bf16.mxu1 %v907_v35 }
  0x5b   : > { %910 = vmatpush3.bf16.msra.mxu1 %v907_v35 }
 0x118   : > { %v824_v37 = vpop.f32.mrb[0].mxu0 }
 0x119   : > { %v432_v38 = vadd.f32 %v824_v37, %v771_v36  ;;  %v426_v39 = vpop.f32.mrb[1].mxu0 }
 0x11a   : > { %v427_v40 = vadd.f32 %v771_v36, %v426_v39 }
 0x11b   : > { %v436_v42 = vmax.f32 %v432_v38, 0.0 }
 0x11c   : > { %v435_v41 = vmax.f32 %v427_v40, 0.0 }
 0x11e   : > { %857 = vmatprep.mubr.f32.mxu1 %v435_v41 }
 0x11f   : > { %858 = vmatmul.mubr.f32.vlgmr.msra.gmra.mrb[0].mxu1 %v436_v42 }
 0x1f2   : > { %v859_v45 = vpop.f32.mrb[0].mxu1 }
 0x1f3   : > { %v532_v48 = vadd.f32 %v859_v45, %v774_v44  ;;  %v526_v49 = vpop.f32.mrb[1].mxu1 }
 0x1f4   : > { %v527_v51 = vadd.f32 %v774_v44, %v526_v49 }
 0x1f5   : > { %v537_v52 = vmul.f32 %v535_v46, %v532_v48 }
 0x1f6   : > { %v536_v53 = vmul.f32 %v535_v46, %v527_v51 }
 0x1f7   : > { %v543_v54 = vadd.f32 %v541_v47, %v537_v52 }
 0x1f8   : > { %v542_v55 = vadd.f32 %v540_v50, %v536_v53 }
 0x1f9   : > { %v545_v58 = vmul.f32 %v543_v54, %v543_v54 }
 0x1fa   : > { %v544_v56 = vmul.f32 %v542_v55, %v542_v55 }
 0x1fb   : > { %v549_v59 = vsel %vm353_vm0, %v545_v58, 0.0 }
 0x1fc   : > { %v546_v57 = vsel %vm353_vm0, %v544_v56, 0.0 }
 0x1fd   : > { %547 = vadd.xlane.f32.xlu0 %v546_v57 }
 0x201   : > { %550 = vadd.xlane.f32.xlu0 %v549_v59 }
 0x28a   : > { %v548_v60 = vpop.xlane.xlu0 %547 }
 0x28b   : > { %v552_v61 = vadd.f32 1e-12, %v548_v60 }
 0x28d   : > { %1009 = vrsqrt.f32 %v552_v61 }
 0x28e   : > { %v551_v62 = vpop.xlane.xlu0 %550 }
 0x28f   : > { %v553_v63 = vadd.f32 1e-12, %v551_v62 }
 0x291   : > { %1011 = vrsqrt.f32 %v553_v63 }
 0x297   : > { %v1010_v0 = vpop.eup %1009 }
 0x298   : > { %v556_v1 = vmul.f32 %v1010_v0, %v542_v55 }
 0x29a   : > { %558 = vst.msk [vmem:[#allocation2] sm:$0xff] %vm353_vm0, %v556_v1 }
 0x29b   : > { %v1012_v2 = vpop.eup %1011 }
 0x29c   : > { %v557_v3 = vmul.f32 %v1012_v2, %v543_v54 }
 0x29e   : > { %559 = vst.msk [vmem:[#allocation2 + $0x8] sm:$0xff] %vm353_vm0, %v557_v3 }
 0x29f PF: > { %v562_v4 = vld [vmem:[%s1280_s15] sm:$0xff]  ;;  %v563_v5 = vld [vmem:[%s1280_s15 + $0x8] sm:$0xff]  ;;  %v564_v6 = vld [vmem:[%s1280_s15 + $0x10] sm:$0xff]  ;;  %vm566_vm1 = vcmask 261120   ;;  %s783_s13 = sshll.u32 %s1111_s9, 2  ;;  %s666_s29 = sshll.u32 %s1282_s14, 4  ;;  %s1373_s29 = int_to_ptr.vmem [resolvable:$true] %s666_s29 }
 0x2a0   : > { %v911_v7 = vpack.c.bf16 %v563_v5, %v562_v4  ;;  %v565_v8 = vld [vmem:[%s1280_s15 + $0x18] sm:$0xff]  ;;  %s663_s10 = sadd.s32 %s1107_s8, %s783_s13  ;;  %s1459_s6 = sand.u32 1, %s1091_s27  }
 0x2a1   : > { %v560_v9 = vld [vmem:[#allocation2] sm:$0xff]  ;;  %v915_v10 = vpack.c.bf16 %v565_v8, %v564_v6  ;;  %s780_s19 = sshll.u32 %s663_s10, 7  ;;  %s1379_s16 = scalar_lea.sflag [#allocation7], %s1459_s6 }
 0x2a2   : > { %868 = vmatprep.mubr.msk.f32.mxu0 %vm566_vm1, %v560_v9  ;;  %912 = vmatprep.subr.bf16.mxu0 %v911_v7  ;;  %s1371_s15 = scalar_lea.hbm %s1444_s7, %s780_s19  ;;  %s1013_s8 = scalar_lea.vmem %s1373_s29, 256 }
 0x2a3   : > { %914 = vmatpush3.bf16.msra.mxu0 %v911_v7  ;;  %p1014_p5 = scmp.ne.s32.totalorder %s1373_s29, %s1013_s8  ;;  %s1125_s9 = smov [#allocation6]  }
 0x2a4   : > { %916 = vmatprep.subr.bf16.mxu0 %v915_v10  ;;  %s1017_s17 = sshll.u32 %s1125_s9, 4  ;;  %s1018_s17 = int_to_ptr.vmem [resolvable:$false] %s1017_s17 }
 0x2a5   : > { %v561_v11 = vld [vmem:[#allocation2 + $0x8] sm:$0xff]  ;;  %p1015_p6 = pnand %p1014_p5, %p1251_p10  ;;  %s1019_s11 = scalar_lea.vmem %s1018_s17, 512 }
 0x2a6   : > { %p1020_p8 = scmp.lt.s32.totalorder %s1373_s29, %s1018_s17  ;;  %p1021_p9 = scmp.lt.s32.totalorder %s1019_s11, %s1013_s8 }
 0x2a7   : > { %918 = vmatpush3.bf16.msra.mxu0 %v915_v10  ;;  %p1016_p7 = pneg %p1015_p6 }
 0x2a8   : > { %p1022_p11 = por %p1021_p9, %p1020_p8 }
 0x2aa   : > { %869 = vmatmul.mubr.msk.f32.vlgmr.msra.gmra.mrb[0].mxu0 %vm566_vm1, %v561_v11  ;;  %p1023_p13 = pnand %p1022_p11, %p1016_p7 }
 0x37d   : > { %v870_v12 = vpop.f32.mrb[0].mxu0 }
 0x37e   : > { %649 = vst [vmem:[%s1282_s14 + $0x8] sm:$0xff] %v870_v12  ;;  %v639_v13 = vpop.f32.mrb[1].mxu0 }
 0x37f   : > { %648 = vst [vmem:[%s1282_s14] sm:$0xff] %v639_v13 }
 0x380   : > { %1026 = shalt.err (!%p1023_p13)
}
 0x381   : > { %s1027_s14 = scalar_lea.hbm %s1371_s15, 256  ;;  %s1031_s13 = scalar_lea.hbm %s1444_s7, 1536 }
 0x382   : > { %p1028_p0 = scmp.ne.s32.totalorder %s1371_s15, %s1027_s14  ;;  %p1032_p3 = scmp.lt.u32.totalorder %s1371_s15, %s1444_s7 }
 0x383   : > { %p1033_p4 = scmp.lt.u32.totalorder %s1031_s13, %s1027_s14  ;;  %p1035_p6 = scmp.lt.u32.totalorder %s1027_s14, %s1371_s15 }
 0x384   : > { %p1029_p1 = pnand %p1028_p0, %p1251_p10 }
 0x385   : > { %p1034_p5 = por %p1033_p4, %p1032_p3 }
 0x386   : > { %p1030_p2 = pneg %p1029_p1 }
 0x387   : > { %p1036_p7 = por %p1035_p6, %p1034_p5 }
 0x389   : > { %p1037_p8 = pnand %p1036_p7, %p1030_p2 }
 0x38b   : > { %1040 = shalt.err (!%p1037_p8)
}
 0x38c   : > { %s1126_s18 = smov 128   ;;  %s1127_s21 = smov 256  }
 0x38d   : > { %s1128_s6 = smov 8  }
 0x38e   : > { %919 = dma.vmem_to_hbm [thread:$0]  (%p1251_p10), %s1373_s29, 256, %s1371_s15, %s1379_s16, %s1126_s18, %s1127_s21, %s1128_s6  }
 0x38f PF: > { %p925_p9 = scmp.ge.s32.totalorder %s1123_s0, 2  ;;  %s681_s8 = sand.u32 1, %s1087_s26  }
 0x390   : > { %s682_s9 = scalar_lea.sflag [#allocation7], %s681_s8 }
 0x391   : > { %p922_p11 = pnand %p925_p9, %p1258_p12 }
 0x393   : > { %1082 = dma.done.wait (!%p922_p11), %s682_s9, 256  }
 0x394   : > { %1084 = vsyncadd (!%p922_p11), %s682_s9, 4294967040  ;;  %s21_s0 = sadd.s32 1, %s1123_s0   ;;  %s1460_s8 = sld [smem:[#allocation9_spill]] }
 0x395   : > { %p18_p13 = scmp.ge.s32.totalorder %s21_s0, 8   ;;  %s1461_s9 = sld [smem:[#allocation10_spill]] }
 0x396   : > { %s1462_s10 = sld [smem:[#allocation11_spill]]  ;;  %s1463_s11 = sld [smem:[#allocation12_spill]] }
 0x397   : > { %s1464_s26 = smov %s1091_s27  ;;  %s1465_s27 = smov %s1095_s28 }
 0x398   : > { %s1466_s28 = smov %s1256_s24  ;;  %s1467_s29 = smov %s1103_s30 }
 0x399   : > { %s1468_s30 = smov %s1245_s20  ;;  %20 = sbr.rel (!%p18_p13) target bundleno = 9 (0x9), region = 129 }
 0x3a0   :  { %687 = vsyncpa [#allocation7], 1 }
 0x3a1   :  { %689 = vsyncpa [#allocation7 + $0x1], 1 }

</bundles_post_ra>
